<compile_context>
chip_gen: v5e
topology: v5e:2x2
jax: 0.10.0
libtpu: 0.0.40
codegen_flags: <defaults>
</compile_context>

<pallas_src>
import jax
import jax.numpy as jnp
from jax import lax
from jax.experimental import pallas as pl
from jax.experimental.pallas import tpu as pltpu

X_SIZE = 64          # stand-in for config.data.x_size
HIDDEN = (512, 128, 32, 8)
LN_EPS = 1e-5
LEAK = 0.2
TILE_B = 256         # default batch tile (multiple of 128 for v5e, 256 for v6e/v7x MXU fill)


def _round_up(n, m):
    return ((n + m - 1) // m) * m


def _leaky_relu(h):
    # max(h, 0.2*h) == LeakyReLU(0.2) (positive slope < 1); one VALU op instead of cmp+select.
    return jnp.maximum(h, LEAK * h)


def _layernorm(h, g, b):
    # Single-pass variance: the two lane reductions (sum h, sum h^2) are independent,
    # so XLU work overlaps better. Fine in f32 at these widths (verified vs reference).
    mu = jnp.mean(h, axis=-1, keepdims=True)
    ms = jnp.mean(h * h, axis=-1, keepdims=True)
    var = ms - mu * mu
    return (h - mu) * lax.rsqrt(var + LN_EPS) * g + b


def _block(h, w_ref, g_ref, b_ref):
    # bf16 MXU inputs, f32 accumulation; LayerNorm / activation in f32.
    h = jnp.dot(h.astype(jnp.bfloat16), w_ref[...],
                preferred_element_type=jnp.float32)
    return _leaky_relu(_layernorm(h, g_ref[...], b_ref[...]))


def discriminator_kernel(
    x_ref,
    w1_ref, g1_ref, b1_ref,
    w2_ref, g2_ref, b2_ref,
    w3_ref, g3_ref, b3_ref,
    w4_ref, g4_ref, b4_ref,
    w5_ref, b5_ref,
    o_ref,
):
    h = x_ref[...].astype(jnp.float32)
    h = _block(h, w1_ref, g1_ref, b1_ref)   # (TB, 512)
    h = _block(h, w2_ref, g2_ref, b2_ref)   # (TB, 128)
    h = _block(h, w3_ref, g3_ref, b3_ref)   # (TB, 32)
    h = _block(h, w4_ref, g4_ref, b4_ref)   # (TB, 8)
    # Final Linear(8 -> 1): VPU reduce over 8 lanes + scalar bias from SMEM.
    out = jnp.sum(h * w5_ref[...], axis=-1, keepdims=True) + b5_ref[0, 0]
    o_ref[...] = out.astype(o_ref.dtype)


def init_params(key):
    """Deterministic synthetic init (module uses init_weights; only shapes matter)."""
    dims = (X_SIZE,) + HIDDEN + (1,)
    params = []
    keys = jax.random.split(key, len(dims) - 1)
    for i in range(len(dims) - 1):
        fan_in, fan_out = dims[i], dims[i + 1]
        # weight stored as (in, out) — i.e. PyTorch weight (out, in) transposed
        w = jax.random.normal(keys[i], (fan_in, fan_out), jnp.float32) * 0.02
        params.append(w)
    ln_params = []
    for d in HIDDEN:
        ln_params.append((jnp.ones((1, d), jnp.float32),     # gamma
                          jnp.zeros((1, d), jnp.float32)))   # beta
    b5 = jnp.zeros((1, 1), jnp.float32)                       # final Linear bias
    return params, ln_params, b5


def discriminator_forward(x, params, ln_params, b5, *, tile_b=TILE_B):
    w1, w2, w3, w4, w5 = params
    (g1, bb1), (g2, bb2), (g3, bb3), (g4, bb4) = ln_params
    B, F = x.shape

    # bf16 weights: native MXU rate + half the resident VMEM / DMA bytes.
    w1b, w2b, w3b, w4b = (w.astype(jnp.bfloat16) for w in (w1, w2, w3, w4))
    w5_row = w5.reshape(1, -1).astype(jnp.float32)            # (1, 8) for VPU reduce
    b5_s = jnp.asarray(b5, jnp.float32).reshape(1, 1)         # scalar bias in SMEM

    # Batch tile: multiple of 8 (sublanes); pad the batch to a tile multiple.
    tile_b = _round_up(max(tile_b, 8), 8)
    tb = min(tile_b, _round_up(B, 8))
    b_pad = _round_up(B, tb)
    if b_pad != B:
        x = jnp.concatenate([x, jnp.zeros((b_pad - B, F), x.dtype)], axis=0)

    grid = (b_pad // tb,)

    def const_spec(arr):
        # Full-array block with a constant index_map -> fetched once, VMEM-resident.
        return pl.BlockSpec(arr.shape, lambda i: (0,) * arr.ndim)

    in_specs = [
        pl.BlockSpec((tb, F), lambda i: (i, 0)),              # x: streams per grid step
        const_spec(w1b), const_spec(g1), const_spec(bb1),
        const_spec(w2b), const_spec(g2), const_spec(bb2),
        const_spec(w3b), const_spec(g3), const_spec(bb3),
        const_spec(w4b), const_spec(g4), const_spec(bb4),
        const_spec(w5_row),
        pl.BlockSpec(memory_space=pltpu.MemorySpace.SMEM),    # b5 scalar
    ]
    out_specs = pl.BlockSpec((tb, 1), lambda i: (i, 0))

    flops = 2 * b_pad * (F * 512 + 512 * 128 + 128 * 32 + 32 * 8 + 8)
    weight_bytes = (sum(int(w.size) for w in (w1b, w2b, w3b, w4b)) * 2
                    + int(w5_row.size) * 4 + 4)
    ln_bytes = sum((int(g.size) + int(b.size)) * 4 for (g, b) in ln_params)
    cost = pl.CostEstimate(
        flops=flops,
        transcendentals=4 * b_pad,                            # one rsqrt per row per LayerNorm
        bytes_accessed=b_pad * F * 4 + weight_bytes + ln_bytes + b_pad * 4,
    )

    out = pl.pallas_call(
        discriminator_kernel,
        out_shape=jax.ShapeDtypeStruct((b_pad, 1), jnp.float32),
        grid=grid,
        in_specs=in_specs,
        out_specs=out_specs,
        compiler_params=pltpu.CompilerParams(
            dimension_semantics=("parallel",),                # megacore sharding on v7x
        ),
        cost_estimate=cost,
    )(x, w1b, g1, bb1, w2b, g2, bb2, w3b, g3, bb3, w4b, g4, bb4, w5_row, b5_s)

    return out[:B]


def reference_forward(x, params, ln_params, b5):
    """Pure-JAX f32 reference matching the PyTorch module semantics."""
    w1, w2, w3, w4, w5 = params
    h = x.astype(jnp.float32)
    for w, (g, b) in zip((w1, w2, w3, w4), ln_params):
        h = h @ w
        mu = jnp.mean(h, axis=-1, keepdims=True)
        var = jnp.mean((h - mu) ** 2, axis=-1, keepdims=True)
        h = (h - mu) / jnp.sqrt(var + LN_EPS) * g + b
        h = jnp.where(h > 0, h, LEAK * h)
    return h @ w5 + b5


def reference_forward_bf16(x, params, ln_params, b5):
    """Reference mirroring the kernel's precision schedule (bf16 MXU inputs, f32 accum/LN)."""
    w1, w2, w3, w4, w5 = params
    h = x.astype(jnp.float32)
    for w, (g, b) in zip((w1, w2, w3, w4), ln_params):
        h = jnp.dot(h.astype(jnp.bfloat16), w.astype(jnp.bfloat16),
                    preferred_element_type=jnp.float32)
        mu = jnp.mean(h, axis=-1, keepdims=True)
        var = jnp.mean((h - mu) ** 2, axis=-1, keepdims=True)
        h = (h - mu) / jnp.sqrt(var + LN_EPS) * g + b
        h = jnp.where(h > 0, h, LEAK * h)
    return jnp.sum(h * w5.reshape(1, -1), axis=-1, keepdims=True) + b5


if __name__ == "__main__":
    key = jax.random.PRNGKey(0)
    kx, kp = jax.random.split(key)

    B = 20                                          # deliberately not a tile multiple
    x = jax.random.normal(kx, (B, X_SIZE), jnp.float32)
    params, ln_params, b5 = init_params(kp)

    # Small tile so the test exercises a multi-step grid plus the batch-padding path.
    out = discriminator_forward(x, params, ln_params, b5, tile_b=8)
    out = jax.block_until_ready(out)
    assert out.shape == (B, 1), out.shape

    # Tight check against a reference with the kernel's precision schedule.
    ref_bf16 = reference_forward_bf16(x, params, ln_params, b5)
    assert jnp.allclose(out, ref_bf16, atol=1e-4, rtol=1e-4), (
        f"max abs diff vs bf16-matched ref: {jnp.max(jnp.abs(out - ref_bf16))}"
    )

    # Sanity check against the pure-f32 module semantics (bf16 matmul rounding only).
    ref_f32 = reference_forward(x, params, ln_params, b5)
    assert jnp.allclose(out, ref_f32, atol=2e-2, rtol=2e-2), (
        f"max abs diff vs f32 ref: {jnp.max(jnp.abs(out - ref_f32))}"
    )

    print("KERNEL_OK")
</pallas_src>

<mosaic_0001>
module attributes {stable_mosaic.version = 11 : i64} {
  func.func @discriminator_kernel(%arg0: i32, %arg1: memref<8x64xf32, #tpu.memory_space<vmem>>, %arg2: memref<64x512xbf16, #tpu.memory_space<vmem>>, %arg3: memref<1x512xf32, #tpu.memory_space<vmem>>, %arg4: memref<1x512xf32, #tpu.memory_space<vmem>>, %arg5: memref<512x128xbf16, #tpu.memory_space<vmem>>, %arg6: memref<1x128xf32, #tpu.memory_space<vmem>>, %arg7: memref<1x128xf32, #tpu.memory_space<vmem>>, %arg8: memref<128x32xbf16, #tpu.memory_space<vmem>>, %arg9: memref<1x32xf32, #tpu.memory_space<vmem>>, %arg10: memref<1x32xf32, #tpu.memory_space<vmem>>, %arg11: memref<32x8xbf16, #tpu.memory_space<vmem>>, %arg12: memref<1x8xf32, #tpu.memory_space<vmem>>, %arg13: memref<1x8xf32, #tpu.memory_space<vmem>>, %arg14: memref<1x8xf32, #tpu.memory_space<vmem>>, %arg15: memref<1x1xf32, #tpu.memory_space<smem>>, %arg16: memref<8x1xf32, #tpu.memory_space<vmem>>) attributes {dimension_semantics = [#tpu.dimension_semantics<parallel>], iteration_bounds = array<i64: 3>, scalar_prefetch = 0 : i64, scratch_operands = 0 : i64, tpu.core_type = #tpu.core_type<tc>, window_params = [{transform_indices = @transform_0, window_bounds = array<i64: 8, 64>}, {pipeline_mode = #tpu.pipeline_mode<synchronous>, transform_indices = @transform_1, window_bounds = array<i64: 64, 512>}, {pipeline_mode = #tpu.pipeline_mode<synchronous>, transform_indices = @transform_2, window_bounds = array<i64: 1, 512>}, {pipeline_mode = #tpu.pipeline_mode<synchronous>, transform_indices = @transform_3, window_bounds = array<i64: 1, 512>}, {pipeline_mode = #tpu.pipeline_mode<synchronous>, transform_indices = @transform_4, window_bounds = array<i64: 512, 128>}, {pipeline_mode = #tpu.pipeline_mode<synchronous>, transform_indices = @transform_5, window_bounds = array<i64: 1, 128>}, {pipeline_mode = #tpu.pipeline_mode<synchronous>, transform_indices = @transform_6, window_bounds = array<i64: 1, 128>}, {pipeline_mode = #tpu.pipeline_mode<synchronous>, transform_indices = @transform_7, window_bounds = array<i64: 128, 32>}, {pipeline_mode = #tpu.pipeline_mode<synchronous>, transform_indices = @transform_8, window_bounds = array<i64: 1, 32>}, {pipeline_mode = #tpu.pipeline_mode<synchronous>, transform_indices = @transform_9, window_bounds = array<i64: 1, 32>}, {pipeline_mode = #tpu.pipeline_mode<synchronous>, transform_indices = @transform_10, window_bounds = array<i64: 32, 8>}, {pipeline_mode = #tpu.pipeline_mode<synchronous>, transform_indices = @transform_11, window_bounds = array<i64: 1, 8>}, {pipeline_mode = #tpu.pipeline_mode<synchronous>, transform_indices = @transform_12, window_bounds = array<i64: 1, 8>}, {pipeline_mode = #tpu.pipeline_mode<synchronous>, transform_indices = @transform_13, window_bounds = array<i64: 1, 8>}, {transform_indices = @transform_14, window_bounds = array<i64: 1, 1>}, {transform_indices = @transform_15, window_bounds = array<i64: 8, 1>}]} {
    %c0 = arith.constant 0 : index
    %c0_0 = arith.constant 0 : index
    %0 = vector.load %arg1[%c0, %c0_0] : memref<8x64xf32, #tpu.memory_space<vmem>>, vector<8x64xf32>
    %1 = arith.truncf %0 : vector<8x64xf32> to vector<8x64xbf16>
    %c0_1 = arith.constant 0 : index
    %c0_2 = arith.constant 0 : index
    %2 = vector.load %arg2[%c0_1, %c0_2] : memref<64x512xbf16, #tpu.memory_space<vmem>>, vector<64x512xbf16>
    %cst = arith.constant dense<0.000000e+00> : vector<8x512xf32>
    %3 = tpu.matmul %1, %2, %cst {dimension_numbers = #tpu.dot_dimension_numbers<[1], [0], [0], [1], [0, 0, 1, 1], [], []>} : vector<8x64xbf16>, vector<64x512xbf16>, vector<8x512xf32> -> vector<8x512xf32>
    %c0_3 = arith.constant 0 : index
    %c0_4 = arith.constant 0 : index
    %4 = vector.load %arg3[%c0_3, %c0_4] : memref<1x512xf32, #tpu.memory_space<vmem>>, vector<1x512xf32>
    %c0_5 = arith.constant 0 : index
    %c0_6 = arith.constant 0 : index
    %5 = vector.load %arg4[%c0_5, %c0_6] : memref<1x512xf32, #tpu.memory_space<vmem>>, vector<1x512xf32>
    %cst_7 = arith.constant dense<0.000000e+00> : vector<8xf32>
    %6 = vector.multi_reduction <add>, %3, %cst_7 [1] : vector<8x512xf32> to vector<8xf32>
    %7 = vector.shape_cast %6 : vector<8xf32> to vector<8x1xf32>
    %cst_8 = arith.constant 5.120000e+02 : f32
    %8 = vector.broadcast %cst_8 : f32 to vector<8x1xf32>
    %9 = arith.divf %7, %8 : vector<8x1xf32>
    %10 = arith.mulf %3, %3 : vector<8x512xf32>
    %cst_9 = arith.constant dense<0.000000e+00> : vector<8xf32>
    %11 = vector.multi_reduction <add>, %10, %cst_9 [1] : vector<8x512xf32> to vector<8xf32>
    %12 = vector.shape_cast %11 : vector<8xf32> to vector<8x1xf32>
    %cst_10 = arith.constant 5.120000e+02 : f32
    %13 = vector.broadcast %cst_10 : f32 to vector<8x1xf32>
    %14 = arith.divf %12, %13 : vector<8x1xf32>
    %15 = arith.mulf %9, %9 : vector<8x1xf32>
    %16 = arith.subf %14, %15 : vector<8x1xf32>
    %17 = vector.broadcast %9 : vector<8x1xf32> to vector<8x512xf32>
    %18 = arith.subf %3, %17 : vector<8x512xf32>
    %cst_11 = arith.constant 9.99999974E-6 : f32
    %19 = vector.broadcast %cst_11 : f32 to vector<8x1xf32>
    %20 = arith.addf %16, %19 : vector<8x1xf32>
    %21 = math.rsqrt %20 : vector<8x1xf32>
    %22 = vector.broadcast %21 : vector<8x1xf32> to vector<8x512xf32>
    %23 = arith.mulf %18, %22 : vector<8x512xf32>
    %24 = vector.broadcast %4 : vector<1x512xf32> to vector<8x512xf32>
    %25 = arith.mulf %23, %24 : vector<8x512xf32>
    %26 = vector.broadcast %5 : vector<1x512xf32> to vector<8x512xf32>
    %27 = arith.addf %25, %26 : vector<8x512xf32>
    %cst_12 = arith.constant 2.000000e-01 : f32
    %28 = vector.broadcast %cst_12 : f32 to vector<8x512xf32>
    %29 = arith.mulf %28, %27 : vector<8x512xf32>
    %30 = arith.maximumf %27, %29 : vector<8x512xf32>
    %31 = arith.truncf %30 : vector<8x512xf32> to vector<8x512xbf16>
    %c0_13 = arith.constant 0 : index
    %c0_14 = arith.constant 0 : index
    %32 = vector.load %arg5[%c0_13, %c0_14] : memref<512x128xbf16, #tpu.memory_space<vmem>>, vector<512x128xbf16>
    %cst_15 = arith.constant dense<0.000000e+00> : vector<8x128xf32>
    %33 = tpu.matmul %31, %32, %cst_15 {dimension_numbers = #tpu.dot_dimension_numbers<[1], [0], [0], [1], [0, 0, 1, 1], [], []>} : vector<8x512xbf16>, vector<512x128xbf16>, vector<8x128xf32> -> vector<8x128xf32>
    %c0_16 = arith.constant 0 : index
    %c0_17 = arith.constant 0 : index
    %34 = vector.load %arg6[%c0_16, %c0_17] : memref<1x128xf32, #tpu.memory_space<vmem>>, vector<1x128xf32>
    %c0_18 = arith.constant 0 : index
    %c0_19 = arith.constant 0 : index
    %35 = vector.load %arg7[%c0_18, %c0_19] : memref<1x128xf32, #tpu.memory_space<vmem>>, vector<1x128xf32>
    %cst_20 = arith.constant dense<0.000000e+00> : vector<8xf32>
    %36 = vector.multi_reduction <add>, %33, %cst_20 [1] : vector<8x128xf32> to vector<8xf32>
    %37 = vector.shape_cast %36 : vector<8xf32> to vector<8x1xf32>
    %cst_21 = arith.constant 1.280000e+02 : f32
    %38 = vector.broadcast %cst_21 : f32 to vector<8x1xf32>
    %39 = arith.divf %37, %38 : vector<8x1xf32>
    %40 = arith.mulf %33, %33 : vector<8x128xf32>
    %cst_22 = arith.constant dense<0.000000e+00> : vector<8xf32>
    %41 = vector.multi_reduction <add>, %40, %cst_22 [1] : vector<8x128xf32> to vector<8xf32>
    %42 = vector.shape_cast %41 : vector<8xf32> to vector<8x1xf32>
    %cst_23 = arith.constant 1.280000e+02 : f32
    %43 = vector.broadcast %cst_23 : f32 to vector<8x1xf32>
    %44 = arith.divf %42, %43 : vector<8x1xf32>
    %45 = arith.mulf %39, %39 : vector<8x1xf32>
    %46 = arith.subf %44, %45 : vector<8x1xf32>
    %47 = vector.broadcast %39 : vector<8x1xf32> to vector<8x128xf32>
    %48 = arith.subf %33, %47 : vector<8x128xf32>
    %cst_24 = arith.constant 9.99999974E-6 : f32
    %49 = vector.broadcast %cst_24 : f32 to vector<8x1xf32>
    %50 = arith.addf %46, %49 : vector<8x1xf32>
    %51 = math.rsqrt %50 : vector<8x1xf32>
    %52 = vector.broadcast %51 : vector<8x1xf32> to vector<8x128xf32>
    %53 = arith.mulf %48, %52 : vector<8x128xf32>
    %54 = vector.broadcast %34 : vector<1x128xf32> to vector<8x128xf32>
    %55 = arith.mulf %53, %54 : vector<8x128xf32>
    %56 = vector.broadcast %35 : vector<1x128xf32> to vector<8x128xf32>
    %57 = arith.addf %55, %56 : vector<8x128xf32>
    %cst_25 = arith.constant 2.000000e-01 : f32
    %58 = vector.broadcast %cst_25 : f32 to vector<8x128xf32>
    %59 = arith.mulf %58, %57 : vector<8x128xf32>
    %60 = arith.maximumf %57, %59 : vector<8x128xf32>
    %61 = arith.truncf %60 : vector<8x128xf32> to vector<8x128xbf16>
    %c0_26 = arith.constant 0 : index
    %c0_27 = arith.constant 0 : index
    %62 = vector.load %arg8[%c0_26, %c0_27] : memref<128x32xbf16, #tpu.memory_space<vmem>>, vector<128x32xbf16>
    %cst_28 = arith.constant dense<0.000000e+00> : vector<8x32xf32>
    %63 = tpu.matmul %61, %62, %cst_28 {dimension_numbers = #tpu.dot_dimension_numbers<[1], [0], [0], [1], [0, 0, 1, 1], [], []>} : vector<8x128xbf16>, vector<128x32xbf16>, vector<8x32xf32> -> vector<8x32xf32>
    %c0_29 = arith.constant 0 : index
    %c0_30 = arith.constant 0 : index
    %64 = vector.load %arg9[%c0_29, %c0_30] : memref<1x32xf32, #tpu.memory_space<vmem>>, vector<1x32xf32>
    %c0_31 = arith.constant 0 : index
    %c0_32 = arith.constant 0 : index
    %65 = vector.load %arg10[%c0_31, %c0_32] : memref<1x32xf32, #tpu.memory_space<vmem>>, vector<1x32xf32>
    %cst_33 = arith.constant dense<0.000000e+00> : vector<8xf32>
    %66 = vector.multi_reduction <add>, %63, %cst_33 [1] : vector<8x32xf32> to vector<8xf32>
    %67 = vector.shape_cast %66 : vector<8xf32> to vector<8x1xf32>
    %cst_34 = arith.constant 3.200000e+01 : f32
    %68 = vector.broadcast %cst_34 : f32 to vector<8x1xf32>
    %69 = arith.divf %67, %68 : vector<8x1xf32>
    %70 = arith.mulf %63, %63 : vector<8x32xf32>
    %cst_35 = arith.constant dense<0.000000e+00> : vector<8xf32>
    %71 = vector.multi_reduction <add>, %70, %cst_35 [1] : vector<8x32xf32> to vector<8xf32>
    %72 = vector.shape_cast %71 : vector<8xf32> to vector<8x1xf32>
    %cst_36 = arith.constant 3.200000e+01 : f32
    %73 = vector.broadcast %cst_36 : f32 to vector<8x1xf32>
    %74 = arith.divf %72, %73 : vector<8x1xf32>
    %75 = arith.mulf %69, %69 : vector<8x1xf32>
    %76 = arith.subf %74, %75 : vector<8x1xf32>
    %77 = vector.broadcast %69 : vector<8x1xf32> to vector<8x32xf32>
    %78 = arith.subf %63, %77 : vector<8x32xf32>
    %cst_37 = arith.constant 9.99999974E-6 : f32
    %79 = vector.broadcast %cst_37 : f32 to vector<8x1xf32>
    %80 = arith.addf %76, %79 : vector<8x1xf32>
    %81 = math.rsqrt %80 : vector<8x1xf32>
    %82 = vector.broadcast %81 : vector<8x1xf32> to vector<8x32xf32>
    %83 = arith.mulf %78, %82 : vector<8x32xf32>
    %84 = vector.broadcast %64 : vector<1x32xf32> to vector<8x32xf32>
    %85 = arith.mulf %83, %84 : vector<8x32xf32>
    %86 = vector.broadcast %65 : vector<1x32xf32> to vector<8x32xf32>
    %87 = arith.addf %85, %86 : vector<8x32xf32>
    %cst_38 = arith.constant 2.000000e-01 : f32
    %88 = vector.broadcast %cst_38 : f32 to vector<8x32xf32>
    %89 = arith.mulf %88, %87 : vector<8x32xf32>
    %90 = arith.maximumf %87, %89 : vector<8x32xf32>
    %91 = arith.truncf %90 : vector<8x32xf32> to vector<8x32xbf16>
    %c0_39 = arith.constant 0 : index
    %c0_40 = arith.constant 0 : index
    %92 = vector.load %arg11[%c0_39, %c0_40] : memref<32x8xbf16, #tpu.memory_space<vmem>>, vector<32x8xbf16>
    %cst_41 = arith.constant dense<0.000000e+00> : vector<8x8xf32>
    %93 = tpu.matmul %91, %92, %cst_41 {dimension_numbers = #tpu.dot_dimension_numbers<[1], [0], [0], [1], [0, 0, 1, 1], [], []>} : vector<8x32xbf16>, vector<32x8xbf16>, vector<8x8xf32> -> vector<8x8xf32>
    %c0_42 = arith.constant 0 : index
    %c0_43 = arith.constant 0 : index
    %94 = vector.load %arg12[%c0_42, %c0_43] : memref<1x8xf32, #tpu.memory_space<vmem>>, vector<1x8xf32>
    %c0_44 = arith.constant 0 : index
    %c0_45 = arith.constant 0 : index
    %95 = vector.load %arg13[%c0_44, %c0_45] : memref<1x8xf32, #tpu.memory_space<vmem>>, vector<1x8xf32>
    %cst_46 = arith.constant dense<0.000000e+00> : vector<8xf32>
    %96 = vector.multi_reduction <add>, %93, %cst_46 [1] : vector<8x8xf32> to vector<8xf32>
    %97 = vector.shape_cast %96 : vector<8xf32> to vector<8x1xf32>
    %cst_47 = arith.constant 8.000000e+00 : f32
    %98 = vector.broadcast %cst_47 : f32 to vector<8x1xf32>
    %99 = arith.divf %97, %98 : vector<8x1xf32>
    %100 = arith.mulf %93, %93 : vector<8x8xf32>
    %cst_48 = arith.constant dense<0.000000e+00> : vector<8xf32>
    %101 = vector.multi_reduction <add>, %100, %cst_48 [1] : vector<8x8xf32> to vector<8xf32>
    %102 = vector.shape_cast %101 : vector<8xf32> to vector<8x1xf32>
    %cst_49 = arith.constant 8.000000e+00 : f32
    %103 = vector.broadcast %cst_49 : f32 to vector<8x1xf32>
    %104 = arith.divf %102, %103 : vector<8x1xf32>
    %105 = arith.mulf %99, %99 : vector<8x1xf32>
    %106 = arith.subf %104, %105 : vector<8x1xf32>
    %107 = vector.broadcast %99 : vector<8x1xf32> to vector<8x8xf32>
    %108 = arith.subf %93, %107 : vector<8x8xf32>
    %cst_50 = arith.constant 9.99999974E-6 : f32
    %109 = vector.broadcast %cst_50 : f32 to vector<8x1xf32>
    %110 = arith.addf %106, %109 : vector<8x1xf32>
    %111 = math.rsqrt %110 : vector<8x1xf32>
    %112 = vector.broadcast %111 : vector<8x1xf32> to vector<8x8xf32>
    %113 = arith.mulf %108, %112 : vector<8x8xf32>
    %114 = vector.broadcast %94 : vector<1x8xf32> to vector<8x8xf32>
    %115 = arith.mulf %113, %114 : vector<8x8xf32>
    %116 = vector.broadcast %95 : vector<1x8xf32> to vector<8x8xf32>
    %117 = arith.addf %115, %116 : vector<8x8xf32>
    %cst_51 = arith.constant 2.000000e-01 : f32
    %118 = vector.broadcast %cst_51 : f32 to vector<8x8xf32>
    %119 = arith.mulf %118, %117 : vector<8x8xf32>
    %120 = arith.maximumf %117, %119 : vector<8x8xf32>
    %c0_52 = arith.constant 0 : index
    %c0_53 = arith.constant 0 : index
    %121 = vector.load %arg14[%c0_52, %c0_53] : memref<1x8xf32, #tpu.memory_space<vmem>>, vector<1x8xf32>
    %122 = vector.broadcast %121 : vector<1x8xf32> to vector<8x8xf32>
    %123 = arith.mulf %120, %122 : vector<8x8xf32>
    %cst_54 = arith.constant dense<0.000000e+00> : vector<8xf32>
    %124 = vector.multi_reduction <add>, %123, %cst_54 [1] : vector<8x8xf32> to vector<8xf32>
    %125 = vector.shape_cast %124 : vector<8xf32> to vector<8x1xf32>
    %c0_55 = arith.constant 0 : index
    %c0_56 = arith.constant 0 : index
    %126 = memref.load %arg15[%c0_55, %c0_56] : memref<1x1xf32, #tpu.memory_space<smem>>
    %127 = vector.broadcast %126 : f32 to vector<8x1xf32>
    %128 = arith.addf %125, %127 : vector<8x1xf32>
    %c0_57 = arith.constant 0 : index
    %c0_58 = arith.constant 0 : index
    %129 = vector.load %arg16[%c0_57, %c0_58] : memref<8x1xf32, #tpu.memory_space<vmem>>, vector<8x1xf32>
    tpu.vector_store %arg16[%c0_57, %c0_58], %128 {strides = array<i32>} : memref<8x1xf32, #tpu.memory_space<vmem>>, vector<8x1xf32>,
    return
  }
  func.func @transform_0(%arg0: i32) -> (i32, i32) {
    %c0_i32 = arith.constant 0 : i32
    %c0_i32_0 = arith.constant 0 : i32
    return %arg0, %c0_i32 : i32, i32
  }
  func.func @transform_1(%arg0: i32) -> (i32, i32) {
    %c0_i32 = arith.constant 0 : i32
    %c0_i32_0 = arith.constant 0 : i32
    %c0_i32_1 = arith.constant 0 : i32
    return %c0_i32, %c0_i32_0 : i32, i32
  }
  func.func @transform_2(%arg0: i32) -> (i32, i32) {
    %c0_i32 = arith.constant 0 : i32
    %c0_i32_0 = arith.constant 0 : i32
    %c0_i32_1 = arith.constant 0 : i32
    return %c0_i32, %c0_i32_0 : i32, i32
  }
  func.func @transform_3(%arg0: i32) -> (i32, i32) {
    %c0_i32 = arith.constant 0 : i32
    %c0_i32_0 = arith.constant 0 : i32
    %c0_i32_1 = arith.constant 0 : i32
    return %c0_i32, %c0_i32_0 : i32, i32
  }
  func.func @transform_4(%arg0: i32) -> (i32, i32) {
    %c0_i32 = arith.constant 0 : i32
    %c0_i32_0 = arith.constant 0 : i32
    %c0_i32_1 = arith.constant 0 : i32
    return %c0_i32, %c0_i32_0 : i32, i32
  }
  func.func @transform_5(%arg0: i32) -> (i32, i32) {
    %c0_i32 = arith.constant 0 : i32
    %c0_i32_0 = arith.constant 0 : i32
    %c0_i32_1 = arith.constant 0 : i32
    return %c0_i32, %c0_i32_0 : i32, i32
  }
  func.func @transform_6(%arg0: i32) -> (i32, i32) {
    %c0_i32 = arith.constant 0 : i32
    %c0_i32_0 = arith.constant 0 : i32
    %c0_i32_1 = arith.constant 0 : i32
    return %c0_i32, %c0_i32_0 : i32, i32
  }
  func.func @transform_7(%arg0: i32) -> (i32, i32) {
    %c0_i32 = arith.constant 0 : i32
    %c0_i32_0 = arith.constant 0 : i32
    %c0_i32_1 = arith.constant 0 : i32
    return %c0_i32, %c0_i32_0 : i32, i32
  }
  func.func @transform_8(%arg0: i32) -> (i32, i32) {
    %c0_i32 = arith.constant 0 : i32
    %c0_i32_0 = arith.constant 0 : i32
    %c0_i32_1 = arith.constant 0 : i32
    return %c0_i32, %c0_i32_0 : i32, i32
  }
  func.func @transform_9(%arg0: i32) -> (i32, i32) {
    %c0_i32 = arith.constant 0 : i32
    %c0_i32_0 = arith.constant 0 : i32
    %c0_i32_1 = arith.constant 0 : i32
    return %c0_i32, %c0_i32_0 : i32, i32
  }
  func.func @transform_10(%arg0: i32) -> (i32, i32) {
    %c0_i32 = arith.constant 0 : i32
    %c0_i32_0 = arith.constant 0 : i32
    %c0_i32_1 = arith.constant 0 : i32
    return %c0_i32, %c0_i32_0 : i32, i32
  }
  func.func @transform_11(%arg0: i32) -> (i32, i32) {
    %c0_i32 = arith.constant 0 : i32
    %c0_i32_0 = arith.constant 0 : i32
    %c0_i32_1 = arith.constant 0 : i32
    return %c0_i32, %c0_i32_0 : i32, i32
  }
  func.func @transform_12(%arg0: i32) -> (i32, i32) {
    %c0_i32 = arith.constant 0 : i32
    %c0_i32_0 = arith.constant 0 : i32
    %c0_i32_1 = arith.constant 0 : i32
    return %c0_i32, %c0_i32_0 : i32, i32
  }
  func.func @transform_13(%arg0: i32) -> (i32, i32) {
    %c0_i32 = arith.constant 0 : i32
    %c0_i32_0 = arith.constant 0 : i32
    %c0_i32_1 = arith.constant 0 : i32
    return %c0_i32, %c0_i32_0 : i32, i32
  }
  func.func @transform_14(%arg0: i32) -> (i32, i32) {
    %c0_i32 = arith.constant 0 : i32
    %c0_i32_0 = arith.constant 0 : i32
    %c0_i32_1 = arith.constant 0 : i32
    return %c0_i32, %c0_i32_0 : i32, i32
  }
  func.func @transform_15(%arg0: i32) -> (i32, i32) {
    %c0_i32 = arith.constant 0 : i32
    %c0_i32_0 = arith.constant 0 : i32
    return %arg0, %c0_i32 : i32, i32
  }
}

</mosaic_0001>

<bundles_post_ra>
// kernel: tpu_custom_call.1
= control target key start
LH: loop header
LB: loop body
LE: loop exit
PB: predicated region body
PF: predicated region fallthrough
CT: control target
= control target key end

     0   :  { %s2071_s0 = inlined_call_operand.vmem [shape: f32[24,64], index: 0, kind: input, shape index: {}]   ;;  %s2072_s1 = inlined_call_operand.hbm [shape: bf16[64,512], index: 1, kind: input, shape index: {}]   ;;  %s2073_s2 = inlined_call_operand.vmem [shape: f32[1,512], index: 2, kind: input, shape index: {}]   ;;  %s2074_s3 = inlined_call_operand.vmem [shape: f32[1,512], index: 3, kind: input, shape index: {}]   ;;  %s2075_s4 = inlined_call_operand.hbm [shape: bf16[512,128], index: 4, kind: input, shape index: {}]   ;;  %s2076_s5 = inlined_call_operand.vmem [shape: f32[1,128], index: 5, kind: input, shape index: {}]   ;;  %s2077_s6 = inlined_call_operand.vmem [shape: f32[1,128], index: 6, kind: input, shape index: {}]   ;;  %s2078_s7 = inlined_call_operand.vmem [shape: bf16[128,32], index: 7, kind: input, shape index: {}]   ;;  %s2079_s8 = inlined_call_operand.vmem [shape: f32[1,32], index: 8, kind: input, shape index: {}]   ;;  %s2080_s9 = inlined_call_operand.vmem [shape: f32[1,32], index: 9, kind: input, shape index: {}]   ;;  %s2081_s10 = inlined_call_operand.vmem [shape: bf16[32,8], index: 10, kind: input, shape index: {}]   ;;  %s2082_s11 = inlined_call_operand.vmem [shape: f32[1,8], index: 11, kind: input, shape index: {}]   ;;  %s2083_s12 = inlined_call_operand.vmem [shape: f32[1,8], index: 12, kind: input, shape index: {}]   ;;  %s2084_s13 = inlined_call_operand.vmem [shape: f32[1,8], index: 13, kind: input, shape index: {}]   ;;  %s2085_s14 = inlined_call_operand.<no memory space> [shape: f32[1,1], index: 14, kind: input, shape index: {}]   ;;  %s2086_s15 = inlined_call_operand.vmem [shape: f32[24,1], index: 15, kind: output, shape index: {}]  }
   0x1   :  { %20 = sst [smem:[#allocation2]] %s2085_s14 }
   0x2   :  { %21 = vsyncpa [#allocation4], 0 }
   0x3   :  { %22 = vsyncpa [#allocation6], 0  ;;  %s1937_s20 = smov 0  }
   0x4 LB: > { %s390_s23 = sshll.u32 %s2072_s1, 4  ;;  %s1400_s24 = sadd.s32 4294967295, %s1842_s20   ;;  %s1842_s20 = sphi %s1937_s20, %s28_s20   ;;  %s391_s23 = int_to_ptr.hbm [resolvable:$true] %s390_s23 }
   0x5   : > { %p1402_p0 = scmp.ge.s32.totalorder %s1842_s20, 1  ;;  %p379_p1 = scmp.lt.s32.totalorder %s1842_s20, 4 }
   0x6   : > { %p1723_p2 = scmp.eq.s32.totalorder %s1400_s24, 0  ;;  %s1844_s25 = smov [#allocation3]  }
   0x7   : > { %p1948_p3 = pnand %p1402_p0, %p379_p1  ;;  %s392_s26 = sshll.u32 %s1844_s25, 4  ;;  %s393_s26 = int_to_ptr.vmem [resolvable:$true] %s392_s26 }
   0x8   : > { %s410_s29 = sshll.u32 %s2075_s4, 4  ;;  %s1845_s30 = smov [#allocation5]   ;;  %s411_s29 = int_to_ptr.hbm [resolvable:$true] %s410_s29 }
   0x9   : > { %p1716_p4 = pneg %p1948_p3  ;;  %s412_s16 = sshll.u32 %s1845_s30, 4  ;;  %s413_s16 = int_to_ptr.vmem [resolvable:$true] %s412_s16 }
   0xa   : > { %s1846_s17 = smov 256   ;;  %s1847_s18 = smov 16  }
   0xb   : > { %p1717_p5 = pnand %p1723_p2, %p1716_p4  ;;  %s1848_s19 = smov 64  }
   0xc   : > { %s1849_s21 = smov 4   ;;  %465 = sbr.rel (%p1948_p3) target bundleno = 1336 (0x538), region = 80 }
   0xd   : > { %1719 = dma.hbm_to_vmem [thread:$0]  (!%p1717_p5), %s391_s23, 2048, %s393_s26, [#allocation4], %s1846_s17, %s1846_s17, %s1847_s18  }
   0xe   : > { %1722 = dma.hbm_to_vmem [thread:$0]  (!%p1717_p5), %s411_s29, 4096, %s413_s16, [#allocation6], %s1848_s19, %s1848_s19, %s1849_s21  }
  0x11   : > { %1833 = dma.done.wait (%p1723_p2), [#allocation4], 2048  }
  0x12   : > { %1835 = vsyncadd (%p1723_p2), [#allocation4], 4294965248 }
  0x13   : > { %1837 = dma.done.wait (%p1723_p2), [#allocation6], 4096  }
  0x14   : > { %1839 = vsyncadd (%p1723_p2), [#allocation6], 4294963200  ;;  %p517_p6 = scmp.lt.s32.totalorder %s1400_s24, 2  ;;  %v1461_v0 = vld [vmem:[#allocation3 + $0x60] sm:$0xf]  ;;  %vm624_vm0 = vcmask 523264  }
  0x15   : > { %v1664_v1 = vld [vmem:[#allocation3 + $0x6c] sm:$0xf0]  ;;  %v1445_v2 = vld [vmem:[#allocation3 + $0x40] sm:$0xf]  ;;  %v1662_v5 = vld [vmem:[#allocation3 + $0x64] sm:$0xf] }
  0x16   : > { %s2089_s24 = smov (!%p517_p6, %s1400_s24), 2  ;;  %v1462_v3 = vor.u32 %v1664_v1, %v1461_v0  ;;  %v1660_v4 = vld [vmem:[#allocation3 + $0x4c] sm:$0xf0]  ;;  %v1463_v6 = vld [vmem:[#allocation3 + $0x70] sm:$0xf0]  ;;  %vm1193_vm9 = vcmask 261120  }
  0x17   : > { %v1466_v7 = vor.u32 %v1662_v5, %v1463_v6  ;;  %v1658_v8 = vld [vmem:[#allocation3 + $0x44] sm:$0xf]  ;;  %s1409_s22 = sshll.u32 %s2089_s24, 3  ;;  %v1446_v9 = vor.u32 %v1660_v4, %v1445_v2  ;;  %v1447_v10 = vld [vmem:[#allocation3 + $0x50] sm:$0xf0]  ;;  %v1850_v4 = vmov 512.0  }
  0x18   : > { %632 = vmatpush.bf16.msra.mxu2 %v1462_v3  ;;  %v1663_v11 = vld [vmem:[#allocation3 + $0x6c] sm:$0xf]  ;;  %v1471_v12 = vld [vmem:[#allocation3 + $0x78] sm:$0xf0]  ;;  %v1429_v13 = vld [vmem:[#allocation3 + $0x20] sm:$0xf]  ;;  %v1450_v15 = vor.u32 %v1658_v8, %v1447_v10  ;;  %s520_s25 = scalar_lea.vmem %s2071_s0, %s1409_s22  ;;  %1752 = vrcp.f32 %v1850_v4  ;;  %s524_s28 = scalar_lea.vmem %s2086_s15, %s1409_s22 }
  0x19   : > { %645 = vmatpush.bf16.msra.mxu1 %v1466_v7  ;;  %v1656_v14 = vld [vmem:[#allocation3 + $0x2c] sm:$0xf0]  ;;  %v1474_v16 = vor.u32 %v1663_v11, %v1471_v12  ;;  %v1654_v17 = vld [vmem:[#allocation3 + $0x24] sm:$0xf]  ;;  %v1431_v18 = vld [vmem:[#allocation3 + $0x30] sm:$0xf0] }
  0x1a   : > { %v1659_v19 = vld [vmem:[#allocation3 + $0x4c] sm:$0xf]  ;;  %v1455_v20 = vld [vmem:[#allocation3 + $0x58] sm:$0xf0]  ;;  %v1430_v22 = vor.u32 %v1656_v14, %v1429_v13  ;;  %v1413_v23 = vld [vmem:[#allocation3] sm:$0xf]  ;;  %v1434_v26 = vor.u32 %v1654_v17, %v1431_v18 }
  0x1b   : > { %671 = vmatpush.bf16.msra.mxu3 %v1474_v16  ;;  %v1458_v21 = vor.u32 %v1659_v19, %v1455_v20  ;;  %v1655_v24 = vld [vmem:[#allocation3 + $0x2c] sm:$0xf]  ;;  %v1652_v25 = vld [vmem:[#allocation3 + $0xc] sm:$0xf0]  ;;  %v1469_v27 = vld [vmem:[#allocation3 + $0x68] sm:$0xf] }
  0x1c   : > { %633 = vmatpush.bf16.msra.mxu2 %v1446_v9  ;;  %v1439_v28 = vld [vmem:[#allocation3 + $0x38] sm:$0xf0]  ;;  %v1665_v29 = vld [vmem:[#allocation3 + $0x74] sm:$0xf0]  ;;  %v1650_v30 = vld [vmem:[#allocation3 + $0x4] sm:$0xf]  ;;  %v1414_v36 = vor.u32 %v1652_v25, %v1413_v23 }
  0x1d   : > { %646 = vmatpush.bf16.msra.mxu1 %v1450_v15  ;;  %v1415_v31 = vld [vmem:[#allocation3 + $0x10] sm:$0xf0]  ;;  %v526_v32 = vld [vmem:[%s520_s25] sm:$0xff]  ;;  %v1442_v33 = vor.u32 %v1655_v24, %v1439_v28  ;;  %v1651_v34 = vld [vmem:[#allocation3 + $0xc] sm:$0xf]  ;;  %v1470_v37 = vor.u32 %v1665_v29, %v1469_v27  ;;  %vm1270_vm14 = vcmask 64512  }
  0x1e   : > { %v1423_v35 = vld [vmem:[#allocation3 + $0x18] sm:$0xf0]  ;;  %v1418_v38 = vor.u32 %v1650_v30, %v1415_v31  ;;  %v1453_v39 = vld [vmem:[#allocation3 + $0x48] sm:$0xf]  ;;  %v1661_v40 = vld [vmem:[#allocation3 + $0x54] sm:$0xf0]  ;;  %v527_v41 = vpack.c.bf16 %v526_v32, %v526_v32  ;;  %v1753_v9 = vpop.eup %1752 }
  0x1f   : > { %672 = vmatpush.bf16.msra.mxu3 %v1458_v21  ;;  %v1426_v42 = vor.u32 %v1651_v34, %v1423_v35  ;;  %v1454_v43 = vor.u32 %v1661_v40, %v1453_v39  ;;  %v1437_v44 = vld [vmem:[#allocation3 + $0x28] sm:$0xf]  ;;  %v1657_v45 = vld [vmem:[#allocation3 + $0x34] sm:$0xf0]  ;;  %v1672_v10 = vld [vmem:[#allocation5 + $0x30] sm:$0xff]  ;;  %v688_v14 = vmul.f32 512.0, %v1753_v9  ;;  %vm692_vm1 = vweird.f32 %v1753_v9 }
  0x20   : > { %634 = vmatpush.bf16.msra.mxu2 %v1430_v22  ;;  %v1438_v46 = vor.u32 %v1657_v45, %v1437_v44  ;;  %v1421_v47 = vld [vmem:[#allocation3 + $0x8] sm:$0xf]  ;;  %v1653_v48 = vld [vmem:[#allocation3 + $0x14] sm:$0xf0]  ;;  %v1680_v11 = vld [vmem:[#allocation5 + $0x70] sm:$0xff]  ;;  %s1320_s25 = sld [smem:[#allocation2]] }
  0x21   : > { %647 = vmatpush.bf16.msra.mxu1 %v1434_v26  ;;  %v1422_v49 = vor.u32 %v1653_v48, %v1421_v47  ;;  %v1673_v5 = vld [vmem:[#allocation5 + $0x38] sm:$0xff]  ;;  %v1688_v12 = vld [vmem:[#allocation5 + $0xb0] sm:$0xff]  ;;  %v1671_v15 = vld [vmem:[#allocation5 + $0x28] sm:$0xff]  ;;  %v689_v19 = vsub.f32 1.0, %v688_v14 }
  0x22   : > { %v1681_v6 = vld [vmem:[#allocation5 + $0x78] sm:$0xff]  ;;  %1020 = vmatpush.bf16.msra.mxu0 %v1673_v5  ;;  %v1696_v13 = vld [vmem:[#allocation5 + $0xf0] sm:$0xff]  ;;  %v1679_v16 = vld [vmem:[#allocation5 + $0x68] sm:$0xff] }
  0x23   : > { %673 = vmatpush.bf16.msra.mxu3 %v1442_v33  ;;  %v1689_v7 = vld [vmem:[#allocation5 + $0xb8] sm:$0xff]  ;;  %v1687_v17 = vld [vmem:[#allocation5 + $0xa8] sm:$0xff]  ;;  %v1670_v20 = vld [vmem:[#allocation5 + $0x20] sm:$0xff]  ;;  %v690_v24 = vmul.f32 %v1753_v9, %v689_v19 }
  0x24   : > { %635 = vmatpush.bf16.msra.mxu2 %v1414_v36  ;;  %v1697_v8 = vld [vmem:[#allocation5 + $0xf8] sm:$0xff]  ;;  %v1695_v18 = vld [vmem:[#allocation5 + $0xe8] sm:$0xff]  ;;  %v1678_v21 = vld [vmem:[#allocation5 + $0x60] sm:$0xff] }
  0x25   : > { %648 = vmatpush.bf16.msra.mxu1 %v1418_v38  ;;  %v1686_v22 = vld [vmem:[#allocation5 + $0xa0] sm:$0xff]  ;;  %v1669_v25 = vld [vmem:[#allocation5 + $0x18] sm:$0xff]  ;;  %v691_v29 = vadd.f32 %v1753_v9, %v690_v24  ;;  %v1668_v31 = vld [vmem:[#allocation5 + $0x10] sm:$0xff] }
  0x26   : > { %1021 = vmatpush.bf16.msra.mxu0 %v1672_v10  ;;  %v1694_v23 = vld [vmem:[#allocation5 + $0xe0] sm:$0xff]  ;;  %v1677_v26 = vld [vmem:[#allocation5 + $0x58] sm:$0xff]  ;;  %v1676_v32 = vld [vmem:[#allocation5 + $0x50] sm:$0xff] }
  0x27   : > { %1475 = vmatmul.msk.bf16.vlgmr.msra.gmra.mxu2 %vm624_vm0, %v527_v41  ;;  %674 = vmatpush.bf16.msra.mxu3 %v1426_v42  ;;  %v1685_v27 = vld [vmem:[#allocation5 + $0x98] sm:$0xff]  ;;  %v1684_v33 = vld [vmem:[#allocation5 + $0x90] sm:$0xff]  ;;  %v693_v35 = vsel %vm692_vm1, %v1753_v9, %v691_v29  ;;  %v1667_v36 = vld [vmem:[#allocation5 + $0x8] sm:$0xff] }
  0x28   : > { %658 = vmatpush.bf16.msrb.mxu2 %v1470_v37  ;;  %1476 = vmatmul.msk.bf16.vlgmr.msra.gmra.mxu1 %vm624_vm0, %v527_v41  ;;  %v1693_v28 = vld [vmem:[#allocation5 + $0xd8] sm:$0xff]  ;;  %v1692_v34 = vld [vmem:[#allocation5 + $0xd0] sm:$0xff]  ;;  %v1675_v37 = vld [vmem:[#allocation5 + $0x48] sm:$0xff] }
  0x29   : > { %1033 = vmatpush.bf16.msrb.mxu1 %v1681_v6  ;;  %v1683_v38 = vld [vmem:[#allocation5 + $0x88] sm:$0xff]  ;;  %v1674_v42 = vld [vmem:[#allocation5 + $0x40] sm:$0xff] }
  0x2a   : > { %1478 = vmatmul.msk.bf16.vlgmr.msra.gmra.mxu3 %vm624_vm0, %v527_v41  ;;  %1022 = vmatpush.bf16.msra.mxu0 %v1671_v15  ;;  %v1691_v39 = vld [vmem:[#allocation5 + $0xc8] sm:$0xff]  ;;  %v1690_v44 = vld [vmem:[#allocation5 + $0xc0] sm:$0xff] }
  0x2b   : > { %1059 = vmatpush.bf16.msrb.mxu3 %v1697_v8 }
  0x2c   : > { %659 = vmatpush.bf16.msrb.mxu2 %v1454_v43  ;;  %v1682_v43 = vld [vmem:[#allocation5 + $0x80] sm:$0xff] }
  0x2d   : > { %1034 = vmatpush.bf16.msrb.mxu1 %v1680_v11 }
  0x2e   : > { %1023 = vmatpush.bf16.msra.mxu0 %v1670_v20 }
  0x2f   : > { %1060 = vmatpush.bf16.msrb.mxu3 %v1696_v13 }
  0x30   : > { %660 = vmatpush.bf16.msrb.mxu2 %v1438_v46 }
  0x31   : > { %1035 = vmatpush.bf16.msrb.mxu1 %v1679_v16 }
  0x32   : > { %1024 = vmatpush.bf16.msra.mxu0 %v1669_v25 }
  0x33   : > { %1061 = vmatpush.bf16.msrb.mxu3 %v1695_v18 }
  0x34   : > { %661 = vmatpush.bf16.msrb.mxu2 %v1422_v49 }
  0x35   : > { %1036 = vmatpush.bf16.msrb.mxu1 %v1678_v21 }
  0x36   : > { %1025 = vmatpush.bf16.msra.mxu0 %v1668_v31 }
  0x37   : > { %1477 = vmatmul.msk.bf16.vlgmr.msrb.gmra.mxu2 %vm624_vm0, %v527_v41  ;;  %1062 = vmatpush.bf16.msrb.mxu3 %v1694_v23  ;;  %v1666_v41 = vld [vmem:[#allocation5] sm:$0xff] }
  0x38   : > { %1046 = vmatpush.bf16.msra.mxu2 %v1689_v7 }
  0x39   : > { %1037 = vmatpush.bf16.msrb.mxu1 %v1677_v26 }
  0x3a   : > { %1026 = vmatpush.bf16.msra.mxu0 %v1667_v36 }
  0x3b   : > { %1063 = vmatpush.bf16.msrb.mxu3 %v1693_v28 }
  0x3c   : > { %1047 = vmatpush.bf16.msra.mxu2 %v1688_v12 }
  0x3d   : > { %1038 = vmatpush.bf16.msrb.mxu1 %v1676_v32 }
  0x3e   : > { %1027 = vmatpush.bf16.msra.mxu0 %v1666_v41 }
  0x3f   : > { %1064 = vmatpush.bf16.msrb.mxu3 %v1692_v34 }
  0x40   : > { %1048 = vmatpush.bf16.msra.mxu2 %v1687_v17 }
  0x41   : > { %1039 = vmatpush.bf16.msrb.mxu1 %v1675_v37 }
  0x43   : > { %1065 = vmatpush.bf16.msrb.mxu3 %v1691_v39 }
  0x44   : > { %1049 = vmatpush.bf16.msra.mxu2 %v1686_v22 }
  0x45   : > { %1040 = vmatpush.bf16.msrb.mxu1 %v1674_v42 }
  0x47   : > { %1066 = vmatpush.bf16.msrb.mxu3 %v1690_v44  ;;  %v1705_v44 = vld [vmem:[%s2078_s7 + $0x38] sm:$0xff] }
  0x48   : > { %1050 = vmatpush.bf16.msra.mxu2 %v1685_v27  ;;  %1178 = vmatpush.bf16.msrb.mxu0 %v1705_v44 }
  0x4c   : > { %1051 = vmatpush.bf16.msra.mxu2 %v1684_v33 }
  0x50   : > { %1052 = vmatpush.bf16.msra.mxu2 %v1683_v38 }
  0x54   : > { %1053 = vmatpush.bf16.msra.mxu2 %v1682_v43  ;;  %v1851_v43 = vmov 128.0  }
  0xa5   : > { %v1976_v50 = vpop.f32.mrf.mxu1 }
  0xa6   : > { %v696_v59 = vmul.f32 %v1976_v50, %v1976_v50 }
  0xaa   : > { %v1978_v51 = vpop.f32.mrf.mxu2 }
  0xab   : > { %v682_v56 = vadd.f32 %v1976_v50, %v1978_v51  ;;  %v695_v58 = vmul.f32 %v1978_v51, %v1978_v51 }
  0xad   : > { %v1980_v52 = vpop.f32.mrf.mxu3  ;;  %v652_v53 = vpop.f32.mrf.mxu1  ;;  %v699_v63 = vadd.f32 %v696_v59, %v695_v58  ;;  %v680_v58 = vld [vmem:[%s2073_s2] sm:$0xf] }
  0xae   : > { %v698_v0 = vmul.f32 %v1980_v52, %v1980_v52  ;;  %v728_v4 = vperm.slane %v680_v58, 1  ;;  %v729_v5 = vperm.slane %v680_v58, 2  ;;  %v730_v6 = vperm.slane %v680_v58, 3 }
  0xb2   : > { %v639_v54 = vpop.f32.mrf.mxu2 }
  0xb5   : > { %v678_v55 = vpop.f32.mrf.mxu3 }
  0xba   : > { %v1984_v57 = vpop.f32.mrf.mxu2 }
  0xbb   : > { %v683_v60 = vadd.f32 %v682_v56, %v1984_v57  ;;  %v697_v61 = vmul.f32 %v1984_v57, %v1984_v57 }
  0xbd   : > { %v684_v62 = vadd.f32 %v683_v60, %v1980_v52  ;;  %v700_v1 = vadd.f32 %v699_v63, %v697_v61  ;;  %v681_v60 = vld [vmem:[%s2074_s3] sm:$0xf] }
  0xbe   : > { %v741_v8 = vperm.slane %v681_v60, 1  ;;  %v742_v9 = vperm.slane %v681_v60, 2  ;;  %v743_v10 = vperm.slane %v681_v60, 3 }
  0xbf   : > { %685 = vadd.xlane.f32.xlu0 %v684_v62  ;;  %v701_v3 = vadd.f32 %v700_v1, %v698_v0  ;;  %v727_v1 = vperm.slane %v680_v58, 0 }
  0xc2   : > { %v665_v2 = vpop.f32.mrf.mxu2 }
  0xc7   : > { %702 = vadd.xlane.f32.xlu0 %v701_v3  ;;  %v740_v3 = vperm.slane %v681_v60, 0 }
 0x132   : > { %v686_v30 = vpop.xlane.xlu0 %685 }
 0x133   : > { %v694_v40 = vmul.f32 %v693_v35, %v686_v30 }
 0x135   : > { %v705_v46 = vmul.f32 %v694_v40, %v694_v40  ;;  %v709_v61 = vsub.f32 %v1984_v57, %v694_v40  ;;  %v707_v62 = vsub.f32 %v1978_v51, %v694_v40  ;;  %v708_v63 = vsub.f32 %v1976_v50, %v694_v40 }
 0x136   : > { %v710_v2 = vsub.f32 %v1980_v52, %v694_v40 }
 0x13a   : > { %v703_v45 = vpop.xlane.xlu0 %702 }
 0x13b   : > { %v704_v47 = vmul.f32 %v703_v45, %v693_v35 }
 0x13d   : > { %v706_v48 = vsub.f32 %v704_v47, %v705_v46  ;;  %v1704_v46 = vld [vmem:[%s2078_s7 + $0x30] sm:$0xff] }
 0x13e   : > { %1179 = vmatpush.bf16.msrb.mxu0 %v1704_v46 }
 0x13f   : > { %v711_v49 = vadd.f32 1e-05, %v706_v48  ;;  %v1703_v48 = vld [vmem:[%s2078_s7 + $0x28] sm:$0xff] }
 0x141   : > { %1754 = vrsqrt.f32 %v711_v49  ;;  %vm718_vm3 = vweird.f32 %v711_v49 }
 0x142   : > { %1756 = vrcp.f32 %v1851_v43  ;;  %1180 = vmatpush.bf16.msrb.mxu0 %v1703_v48  ;;  %v1748_v48 = vld [vmem:[%s2080_s9] ss:$0 sm:$0xff] }
 0x147   : > { %v1755_v53 = vpop.eup %1754 }
 0x148   : > { %v713_v54 = vmul.f32 %v1755_v53, %v711_v49  ;;  %vm719_vm2 = vweird.f32 %v1755_v53  ;;  %v1757_v45 = vpop.eup %1756 }
 0x149   : > { %vm720_vm4 = vmor %vm718_vm3, %vm719_vm2  ;;  %v1077_v47 = vmul.f32 128.0, %v1757_v45  ;;  %vm1081_vm5 = vweird.f32 %v1757_v45  ;;  %vm1323_vm3 = vcmask 7168  }
 0x14a   : > { %v714_v55 = vmul.f32 %v1755_v53, %v713_v54 }
 0x14b   : > { %v1078_v49 = vsub.f32 1.0, %v1077_v47 }
 0x14c   : > { %v715_v56 = vmul.f32 0.5, %v714_v55  ;;  %v1701_v55 = vld [vmem:[%s2078_s7 + $0x18] sm:$0xff] }
 0x14d   : > { %v1079_v54 = vmul.f32 %v1757_v45, %v1078_v49 }
 0x14e   : > { %v716_v59 = vsub.f32 1.5, %v715_v56 }
 0x14f   : > { %v1080_v56 = vadd.f32 %v1757_v45, %v1079_v54 }
 0x150   : > { %v717_v0 = vmul.f32 %v1755_v53, %v716_v59  ;;  %v1700_v59 = vld [vmem:[%s2078_s7 + $0x10] sm:$0xff] }
 0x151   : > { %v1082_v60 = vsel %vm1081_vm5, %v1757_v45, %v1080_v56  ;;  %v1747_v45 = vld [vmem:[%s2079_s8] ss:$0 sm:$0xff] }
 0x152   : > { %v721_v7 = vsel %vm720_vm4, %v1755_v53, %v717_v0  ;;  %v1702_v53 = vld [vmem:[%s2078_s7 + $0x20] sm:$0xff] }
 0x153   : > { %v722_v11 = vmul.f32 %v721_v7, %v707_v62  ;;  %v723_v57 = vmul.f32 %v721_v7, %v708_v63  ;;  %v724_v12 = vmul.f32 %v721_v7, %v709_v61  ;;  %v725_v51 = vmul.f32 %v721_v7, %v710_v2  ;;  %1181 = vmatpush.bf16.msrb.mxu0 %v1702_v53  ;;  %v1699_v61 = vld [vmem:[%s2078_s7 + $0x8] sm:$0xff]  ;;  %v1698_v63 = vld [vmem:[%s2078_s7] sm:$0xff] }
 0x155   : > { %v735_v13 = vmul.f32 %v727_v1, %v722_v11  ;;  %v736_v50 = vmul.f32 %v728_v4, %v723_v57  ;;  %v737_v14 = vmul.f32 %v729_v5, %v724_v12  ;;  %v738_v15 = vmul.f32 %v730_v6, %v725_v51  ;;  %v1745_v57 = vld [vmem:[%s2076_s5] ss:$0 sm:$0xff] }
 0x157   : > { %v748_v16 = vadd.f32 %v740_v3, %v735_v13  ;;  %v749_v17 = vadd.f32 %v741_v8, %v736_v50  ;;  %v750_v52 = vadd.f32 %v742_v9, %v737_v14  ;;  %v751_v18 = vadd.f32 %v743_v10, %v738_v15  ;;  %1182 = vmatpush.bf16.msrb.mxu0 %v1701_v55  ;;  %v1746_v13 = vld [vmem:[%s2077_s6] ss:$0 sm:$0xff] }
 0x159   : > { %v752_v19 = vmul.f32 0.2, %v748_v16  ;;  %v753_v20 = vmul.f32 0.2, %v749_v17  ;;  %v754_v21 = vmul.f32 0.2, %v750_v52 }
 0x15a   : > { %v755_v22 = vmul.f32 0.2, %v751_v18 }
 0x15b   : > { %v756_v23 = vmax.f32 %v748_v16, %v752_v19  ;;  %v757_v24 = vmax.f32 %v749_v17, %v753_v20  ;;  %v758_v25 = vmax.f32 %v750_v52, %v754_v21  ;;  %1183 = vmatpush.bf16.msrb.mxu0 %v1700_v59 }
 0x15c   : > { %v759_v26 = vmax.f32 %v751_v18, %v755_v22  ;;  %v1852_v22 = vmov 32.0  }
 0x15d   : > { %v760_v27 = vpack.c.bf16 %v756_v23, %v756_v23  ;;  %v761_v28 = vpack.c.bf16 %v757_v24, %v757_v24  ;;  %v762_v29 = vpack.c.bf16 %v758_v25, %v758_v25 }
 0x15e   : > { %v763_v30 = vpack.c.bf16 %v759_v26, %v759_v26 }
 0x15f   : > { %1028 = vmatmul.bf16.vlgmr.msra.gmra.mxu0 %v760_v27  ;;  %1041 = vmatmul.bf16.vlgmr.msrb.gmra.mxu1 %v761_v28 }
 0x160   : > { %1054 = vmatmul.bf16.vlgmr.msra.gmra.mxu2 %v762_v29  ;;  %1067 = vmatmul.bf16.vlgmr.msrb.gmra.mxu3 %v763_v30  ;;  %v1707_v30 = vld [vmem:[%s2081_s10 + $0x8] sm:$0xff] }
 0x161   : > { %1184 = vmatpush.bf16.msrb.mxu0 %v1699_v61  ;;  %1261 = vmatpush.bf16.msra.mxu1 %v1707_v30 }
 0x165   : > { %1185 = vmatpush.bf16.msrb.mxu0 %v1698_v63  ;;  %v1853_v63 = vmov 8.0  }
 0x1dc   : > { %v1029_v31 = vpop.f32.mrf.mxu0  ;;  %v1042_v32 = vpop.f32.mrf.mxu1 }
 0x1dd   : > { %v1043_v33 = vadd.f32 %v1042_v32, %v1029_v31  ;;  %v1706_v32 = vld [vmem:[%s2081_s10] sm:$0xff] }
 0x1de   : > { %1262 = vmatpush.bf16.msra.mxu1 %v1706_v32 }
 0x1e3   : > { %v1055_v34 = vpop.f32.mrf.mxu2  ;;  %v1068_v35 = vpop.f32.mrf.mxu3 }
 0x1e4   : > { %v1056_v36 = vadd.f32 %v1055_v34, %v1043_v33  ;;  %v1031_v37 = vpop.f32.mrf.mxu0  ;;  %v1044_v38 = vpop.f32.mrf.mxu1 }
 0x1e6   : > { %v1069_v39 = vadd.f32 %v1068_v35, %v1056_v36 }
 0x1e8   : > { %1074 = vadd.xlane.f32.xlu1 %v1069_v39  ;;  %v1084_v42 = vmul.f32 %v1069_v39, %v1069_v39 }
 0x1eb   : > { %v1057_v40 = vpop.f32.mrf.mxu2  ;;  %v1070_v41 = vpop.f32.mrf.mxu3 }
 0x1f0   : > { %1085 = vadd.xlane.f32.xlu1 %v1084_v42 }
 0x25b   : > { %v1075_v58 = vpop.xlane.xlu1 %1074 }
 0x25c   : > { %v1083_v62 = vmul.f32 %v1082_v60, %v1075_v58 }
 0x25e   : > { %v1088_v1 = vmul.f32 %v1083_v62, %v1083_v62  ;;  %v1090_v11 = vsub.f32 %v1069_v39, %v1083_v62 }
 0x263   : > { %v1086_v0 = vpop.xlane.xlu1 %1085 }
 0x264   : > { %v1087_v2 = vmul.f32 %v1086_v0, %v1082_v60 }
 0x266   : > { %v1089_v3 = vsub.f32 %v1087_v2, %v1088_v1 }
 0x268   : > { %v1091_v4 = vadd.f32 1e-05, %v1089_v3 }
 0x26a   : > { %1758 = vrsqrt.f32 %v1091_v4  ;;  %vm1098_vm7 = vweird.f32 %v1091_v4 }
 0x26b   : > { %1760 = vrcp.f32 %v1852_v22 }
 0x270   : > { %v1759_v5 = vpop.eup %1758 }
 0x271   : > { %v1093_v6 = vmul.f32 %v1759_v5, %v1091_v4  ;;  %vm1099_vm6 = vweird.f32 %v1759_v5  ;;  %v1761_v23 = vpop.eup %1760 }
 0x272   : > { %vm1100_vm8 = vmor %vm1098_vm7, %vm1099_vm6  ;;  %v1198_v24 = vmul.f32 32.0, %v1761_v23  ;;  %vm1202_vm10 = vweird.f32 %v1761_v23 }
 0x273   : > { %v1094_v7 = vmul.f32 %v1759_v5, %v1093_v6 }
 0x274   : > { %v1199_v25 = vsub.f32 1.0, %v1198_v24 }
 0x275   : > { %v1095_v8 = vmul.f32 0.5, %v1094_v7 }
 0x276   : > { %v1200_v26 = vmul.f32 %v1761_v23, %v1199_v25 }
 0x277   : > { %v1096_v9 = vsub.f32 1.5, %v1095_v8 }
 0x278   : > { %v1201_v27 = vadd.f32 %v1761_v23, %v1200_v26 }
 0x279   : > { %v1097_v10 = vmul.f32 %v1759_v5, %v1096_v9 }
 0x27a   : > { %v1203_v29 = vsel %vm1202_vm10, %v1761_v23, %v1201_v27  ;;  %v1751_v23 = vld [vmem:[%s2084_s13] ss:$0 sm:$0xff]  ;;  %v1321_v27 = vstv %s1320_s25 }
 0x27b   : > { %v1101_v12 = vsel %vm1100_vm8, %v1759_v5, %v1097_v10 }
 0x27c   : > { %v1102_v51 = vmul.f32 %v1101_v12, %v1090_v11 }
 0x27e   : > { %v1106_v50 = vmul.f32 %v1745_v57, %v1102_v51 }
 0x280   : > { %v1110_v14 = vadd.f32 %v1746_v13, %v1106_v50 }
 0x282   : > { %v1111_v15 = vmul.f32 0.2, %v1110_v14 }
 0x284   : > { %v1112_v16 = vmax.f32 %v1110_v14, %v1111_v15 }
 0x286   : > { %v1113_v17 = vpack.c.bf16 %v1112_v16, %v1112_v16 }
 0x288   : > { %1186 = vmatmul.bf16.vlgmr.msrb.gmra.mxu0 %v1113_v17  ;;  %v1749_v17 = vld [vmem:[%s2082_s11] ss:$0 sm:$0xff] }
 0x305   : > { %v1187_v52 = vpop.f32.mrf.mxu0 }
 0x306   : > { %v1194_v18 = vsel %vm1193_vm9, %v1187_v52, 0.0  ;;  %v1205_v19 = vmul.f32 %v1187_v52, %v1187_v52 }
 0x307   : > { %1195 = vadd.xlane.f32.xlu2 %v1194_v18 }
 0x308   : > { %v1206_v21 = vsel %vm1193_vm9, %v1205_v19, 0.0  ;;  %v1750_v19 = vld [vmem:[%s2083_s12] ss:$0 sm:$0xff] }
 0x30d   : > { %v1189_v20 = vpop.f32.mrf.mxu0 }
 0x30f   : > { %1207 = vadd.xlane.f32.xlu2 %v1206_v21 }
 0x37a   : > { %v1196_v28 = vpop.xlane.xlu2 %1195 }
 0x37b   : > { %v1204_v31 = vmul.f32 %v1203_v29, %v1196_v28 }
 0x37d   : > { %v1210_v34 = vmul.f32 %v1204_v31, %v1204_v31  ;;  %v1212_v44 = vsub.f32 %v1187_v52, %v1204_v31 }
 0x382   : > { %v1208_v33 = vpop.xlane.xlu2 %1207 }
 0x383   : > { %v1209_v35 = vmul.f32 %v1208_v33, %v1203_v29 }
 0x385   : > { %v1211_v36 = vsub.f32 %v1209_v35, %v1210_v34 }
 0x387   : > { %v1213_v37 = vadd.f32 1e-05, %v1211_v36 }
 0x389   : > { %1762 = vrsqrt.f32 %v1213_v37  ;;  %vm1220_vm12 = vweird.f32 %v1213_v37 }
 0x38a   : > { %1764 = vrcp.f32 %v1853_v63 }
 0x38f   : > { %v1763_v38 = vpop.eup %1762 }
 0x390   : > { %v1215_v39 = vmul.f32 %v1763_v38, %v1213_v37  ;;  %vm1221_vm11 = vweird.f32 %v1763_v38  ;;  %v1765_v0 = vpop.eup %1764 }
 0x391   : > { %vm1222_vm13 = vmor %vm1220_vm12, %vm1221_vm11  ;;  %v1275_v1 = vmul.f32 8.0, %v1765_v0  ;;  %vm1279_vm15 = vweird.f32 %v1765_v0 }
 0x392   : > { %v1216_v40 = vmul.f32 %v1763_v38, %v1215_v39 }
 0x393   : > { %v1276_v2 = vsub.f32 1.0, %v1275_v1 }
 0x394   : > { %v1217_v41 = vmul.f32 0.5, %v1216_v40 }
 0x395   : > { %v1277_v3 = vmul.f32 %v1765_v0, %v1276_v2 }
 0x396   : > { %v1218_v42 = vsub.f32 1.5, %v1217_v41 }
 0x397   : > { %v1278_v4 = vadd.f32 %v1765_v0, %v1277_v3 }
 0x398   : > { %v1219_v43 = vmul.f32 %v1763_v38, %v1218_v42 }
 0x399   : > { %v1280_v5 = vsel %vm1279_vm15, %v1765_v0, %v1278_v4 }
 0x39a   : > { %v1223_v46 = vsel %vm1222_vm13, %v1763_v38, %v1219_v43 }
 0x39b   : > { %v1224_v47 = vmul.f32 %v1223_v46, %v1212_v44 }
 0x39d   : > { %v1228_v49 = vmul.f32 %v1747_v45, %v1224_v47 }
 0x39f   : > { %v1232_v53 = vadd.f32 %v1748_v48, %v1228_v49 }
 0x3a1   : > { %v1233_v54 = vmul.f32 0.2, %v1232_v53 }
 0x3a3   : > { %v1234_v55 = vmax.f32 %v1232_v53, %v1233_v54 }
 0x3a5   : > { %v1235_v56 = vpack.c.bf16 %v1234_v55, %v1234_v55 }
 0x3a7   : > { %1647 = vmatmul.msk.bf16.vlgmr.msra.gmra.mxu1 %vm1193_vm9, %v1235_v56 }
 0x424   : > { %v1264_v58 = vpop.f32.mrf.mxu1 }
 0x425   : > { %v1271_v59 = vsel %vm1270_vm14, %v1264_v58, 0.0  ;;  %v1282_v60 = vmul.f32 %v1264_v58, %v1264_v58 }
 0x426   : > { %1272 = vadd.xlane.f32.xlu0 %v1271_v59 }
 0x427   : > { %v1283_v61 = vsel %vm1270_vm14, %v1282_v60, 0.0 }
 0x428   : > { %1284 = vadd.xlane.f32.xlu1 %v1283_v61 }
 0x42c   : > { %v1266_v62 = vpop.f32.mrf.mxu1 }
 0x499   : > { %v1273_v6 = vpop.xlane.xlu0 %1272 }
 0x49a   : > { %v1281_v7 = vmul.f32 %v1280_v5, %v1273_v6 }
 0x49b   : > { %v1285_v8 = vpop.xlane.xlu1 %1284 }
 0x49c   : > { %v1287_v9 = vmul.f32 %v1281_v7, %v1281_v7  ;;  %v1286_v10 = vmul.f32 %v1285_v8, %v1280_v5  ;;  %v1289_v16 = vsub.f32 %v1264_v58, %v1281_v7 }
 0x49e   : > { %v1288_v11 = vsub.f32 %v1286_v10, %v1287_v9 }
 0x4a0   : > { %v1290_v57 = vadd.f32 1e-05, %v1288_v11 }
 0x4a2   : > { %1766 = vrsqrt.f32 %v1290_v57  ;;  %vm1297_vm1 = vweird.f32 %v1290_v57 }
 0x4a8   : > { %v1767_v12 = vpop.eup %1766 }
 0x4a9   : > { %v1292_v51 = vmul.f32 %v1767_v12, %v1290_v57  ;;  %vm1298_vm0 = vweird.f32 %v1767_v12 }
 0x4aa   : > { %vm1299_vm2 = vmor %vm1297_vm1, %vm1298_vm0 }
 0x4ab   : > { %v1293_v13 = vmul.f32 %v1767_v12, %v1292_v51 }
 0x4ad   : > { %v1294_v50 = vmul.f32 0.5, %v1293_v13 }
 0x4af   : > { %v1295_v14 = vsub.f32 1.5, %v1294_v50 }
 0x4b1   : > { %v1296_v15 = vmul.f32 %v1767_v12, %v1295_v14 }
 0x4b3   : > { %v1300_v52 = vsel %vm1299_vm2, %v1767_v12, %v1296_v15 }
 0x4b4   : > { %v1301_v18 = vmul.f32 %v1300_v52, %v1289_v16 }
 0x4b6   : > { %v1305_v20 = vmul.f32 %v1749_v17, %v1301_v18 }
 0x4b8   : > { %v1309_v21 = vadd.f32 %v1750_v19, %v1305_v20 }
 0x4ba   : > { %v1310_v22 = vmul.f32 0.2, %v1309_v21 }
 0x4bc   : > { %v1311_v24 = vmax.f32 %v1309_v21, %v1310_v22 }
 0x4be   : > { %v1316_v25 = vmul.f32 %v1751_v23, %v1311_v24 }
 0x4c0   : > { %v1317_v26 = vsel %vm1270_vm14, %v1316_v25, 0.0 }
 0x4c1   : > { %1318 = vadd.xlane.f32.xlu2 %v1317_v26 }
 0x534   : > { %v1319_v28 = vpop.xlane.xlu2 %1318 }
 0x535   : > { %v1322_v29 = vadd.f32 %v1321_v27, %v1319_v28 }
 0x537   : > { %1324 = vst.msk [vmem:[%s524_s28] sm:$0xff] %vm1323_vm3, %v1322_v29 }
 0x538 PF: > { %s28_s20 = sadd.s32 1, %s1842_s20  }
 0x539   : > { %p25_p7 = scmp.ge.s32.totalorder %s28_s20, 5  }
 0x53b   :  { %27 = sbr.rel (!%p25_p7) target bundleno = 4 (0x4), region = 119 }
 0x540   :  { %1344 = vsyncpa [#allocation4], 1 }
 0x541   :  { %1346 = vsyncpa [#allocation4 + $0x1], 1 }
 0x542   :  { %1347 = vsyncpa [#allocation6], 1 }

</bundles_post_ra>
